<compile_context>
chip_gen: v6e
topology: v6e:2x2x1
jax: 0.10.0
libtpu: 0.0.40
codegen_flags: <defaults>
</compile_context>

<pallas_src>
import functools
import math

import jax
import jax.numpy as jnp
from jax.experimental import pallas as pl
from jax.experimental.pallas import tpu as pltpu


def _transformer_kernel(x_ref, bias_ref,
                        wqkv_ref, bqkv_ref,
                        wo_ref, bo_ref,
                        wf1x_ref, wf1m_ref, bf1_ref,
                        lnw_ref, lnb_ref,
                        wf2_ref, bf2_ref,
                        out_ref, *, num_heads, head_dim, bt, seq):
    D = num_heads * head_dim
    R = bt * seq

    x = x_ref[...]                                    # [bt, N, D] f32
    xf_bf = x.reshape(R, D).astype(jnp.bfloat16)      # flatten rows / cast once
    bias = bias_ref[...].astype(jnp.float32)          # [bt, N, N] additive mask bias

    # ---- fused QKV projection: one full-K matmul, columns = [Q | K | V],
    # each head-major; the 1/sqrt(head_dim) scale is pre-folded into Q cols.
    qkv = (jnp.dot(xf_bf, wqkv_ref[...], preferred_element_type=jnp.float32)
           + bqkv_ref[...])                           # [R, 3D] f32
    qkv3 = qkv.reshape(bt, seq, 3 * D)

    # ---- multi-head SDPA; heads statically unrolled, batch handled by a
    # batched einsum.  Softmax kept in f32.
    # NOTE: fully-masked rows give a uniform distribution here, whereas
    # PyTorch's SDPA would produce NaN; callers keep at least one valid key.
    # TODO(synk): for production sequence lengths this should be tiled
    # flash-style over key blocks instead of materializing [N, N] scores.
    ctx_parts = []
    for h in range(num_heads):
        lo = h * head_dim
        qh = qkv3[:, :, lo:lo + head_dim].astype(jnp.bfloat16)
        kh = qkv3[:, :, D + lo:D + lo + head_dim].astype(jnp.bfloat16)
        vh = qkv3[:, :, 2 * D + lo:2 * D + lo + head_dim].astype(jnp.bfloat16)
        s = jnp.einsum('bqd,bkd->bqk', qh, kh,
                       preferred_element_type=jnp.float32) + bias     # [bt,N,N]
        m = jnp.max(s, axis=-1, keepdims=True)
        p = jnp.exp(s - m)
        denom = jnp.sum(p, axis=-1, keepdims=True)
        pv = jnp.einsum('bqk,bkd->bqd', p.astype(jnp.bfloat16), vh,
                        preferred_element_type=jnp.float32)           # [bt,N,hd]
        # deferred normalization: one [bt,N,hd] multiply, reciprocal on EUP
        ctx_parts.append(pv * pl.reciprocal(denom, approx=True))
    ctx = jnp.concatenate(ctx_parts, axis=-1)          # [bt, N, D] head-major
    ctx_bf = ctx.reshape(R, D).astype(jnp.bfloat16)

    # ---- out projection: ONE full-K (K = D) matmul.
    message = (jnp.dot(ctx_bf, wo_ref[...], preferred_element_type=jnp.float32)
               + bo_ref[...])                          # [R, D] f32

    # ---- ffn(concat([x, message], -1)) without materializing the concat:
    #      concat @ Wf1 == x @ Wf1[:D] + message @ Wf1[D:]
    msg_bf = message.astype(jnp.bfloat16)
    h1 = (jnp.dot(xf_bf, wf1x_ref[...], preferred_element_type=jnp.float32)
          + jnp.dot(msg_bf, wf1m_ref[...], preferred_element_type=jnp.float32)
          + bf1_ref[...])                              # [R, 2D] f32

    # LayerNorm(2D), elementwise affine, eps=1e-5 (biased variance, as PyTorch)
    mu = jnp.mean(h1, axis=-1, keepdims=True)
    var = jnp.mean((h1 - mu) ** 2, axis=-1, keepdims=True)
    ln = (h1 - mu) * jax.lax.rsqrt(var + 1e-5) * lnw_ref[...] + lnb_ref[...]
    # exact GELU (PyTorch nn.GELU default): 0.5*x*(1+erf(x/sqrt(2)))
    g = 0.5 * ln * (1.0 + jax.lax.erf(ln * (1.0 / math.sqrt(2.0))))

    h2 = (jnp.dot(g.astype(jnp.bfloat16), wf2_ref[...],
                  preferred_element_type=jnp.float32) + bf2_ref[...])  # [R, D]

    out_ref[...] = x + h2.reshape(bt, seq, D)


def transformer_forward_single(x, mask, kp, num_heads, *, block_b=1):
    """One `_forward` call. x: [B,N,D] f32, mask: [B,N,N] bool."""
    B, N, D = x.shape
    assert B % block_b == 0, "block_b must divide the batch"
    head_dim = D // num_heads

    # mirrors `mask0[:, None].mT`: transpose over last two dims, broadcast over
    # heads — passed as a bf16 additive bias (True == attend → 0, False → -1e9).
    bias = jnp.where(jnp.swapaxes(mask, -1, -2), 0.0, -1e9).astype(jnp.bfloat16)

    kernel = functools.partial(_transformer_kernel, num_heads=num_heads,
                               head_dim=head_dim, bt=block_b, seq=N)

    def full(shape):
        # constant-index weight blocks (resident across the whole grid)
        return pl.BlockSpec(shape, lambda b: (0,) * len(shape))

    return pl.pallas_call(
        kernel,
        out_shape=jax.ShapeDtypeStruct((B, N, D), jnp.float32),
        grid=(B // block_b,),
        in_specs=[
            pl.BlockSpec((block_b, N, D), lambda b: (b, 0, 0)),    # x
            pl.BlockSpec((block_b, N, N), lambda b: (b, 0, 0)),    # mask bias (bf16)
            full((D, 3 * D)), full((1, 3 * D)),                    # fused Wqkv, bqkv
            full((D, D)), full((1, D)),                            # Wout, bout
            full((D, 2 * D)), full((D, 2 * D)), full((1, 2 * D)),  # Wffn1 (x|msg), bffn1
            full((1, 2 * D)), full((1, 2 * D)),                    # LN weight, bias
            full((2 * D, D)), full((1, D)),                        # Wffn2, bffn2
        ],
        out_specs=pl.BlockSpec((block_b, N, D), lambda b: (b, 0, 0)),
        # batch elements are fully independent → let the v7x megacore shard them
        compiler_params=pltpu.CompilerParams(
            dimension_semantics=("parallel",)),
    )(x, bias,
      kp["wqkv_t"], kp["bqkv"], kp["wo_t"], kp["bo"],
      kp["wf1x_t"], kp["wf1m_t"], kp["bf1"],
      kp["lnw"], kp["lnb"], kp["wf2_t"], kp["bf2"])


def transformer_forward(x0, x1, mask0, mask1, kp, num_heads, *, block_b=1):
    """Matches Transformer.forward(x0, x1, mask0, mask1) -> (y0, y1)."""
    f = functools.partial(transformer_forward_single, kp=kp,
                          num_heads=num_heads, block_b=block_b)
    return f(x0, mask0), f(x1, mask1)


# ------------------------- parameter construction --------------------------

def init_torch_style_params(key, D):
    """Deterministic synthetic params with the shapes nn.Module __init__ implies."""
    ks = jax.random.split(key, 10)
    s = 0.1
    return {
        "Wqkv_w": jax.random.normal(ks[0], (3 * D, D), jnp.float32) * s,
        "Wqkv_b": jax.random.normal(ks[1], (3 * D,), jnp.float32) * s,
        "out_w":  jax.random.normal(ks[2], (D, D), jnp.float32) * s,
        "out_b":  jax.random.normal(ks[3], (D,), jnp.float32) * s,
        "f1_w":   jax.random.normal(ks[4], (2 * D, 2 * D), jnp.float32) * s,
        "f1_b":   jax.random.normal(ks[5], (2 * D,), jnp.float32) * s,
        "ln_w":   1.0 + jax.random.normal(ks[6], (2 * D,), jnp.float32) * s,
        "ln_b":   jax.random.normal(ks[7], (2 * D,), jnp.float32) * s,
        "f2_w":   jax.random.normal(ks[8], (D, 2 * D), jnp.float32) * s,
        "f2_b":   jax.random.normal(ks[9], (D,), jnp.float32) * s,
    }


def to_kernel_params(p, D, num_heads):
    """Glue: fold `unflatten(-1,(H,hd,3)).transpose(1,2)` into the weight layout,
    fuse QKV, fold the 1/sqrt(head_dim) scale into Wq/bq, split Wffn1 into the
    x- and message-halves, pre-transpose to [in, out], cast weights to bf16."""
    head_dim = D // num_heads
    scale = 1.0 / math.sqrt(head_dim)
    idx = 3 * jnp.arange(D)   # qkv col (h*hd+d) -> Wqkv row 3*(h*hd+d)+{0,1,2}
    wq_t = p["Wqkv_w"][idx + 0, :].T * scale
    wk_t = p["Wqkv_w"][idx + 1, :].T
    wv_t = p["Wqkv_w"][idx + 2, :].T
    bq = p["Wqkv_b"][idx + 0] * scale
    bk = p["Wqkv_b"][idx + 1]
    bv = p["Wqkv_b"][idx + 2]
    f1_t = p["f1_w"].T        # [2D(in), 2D(out)]
    return {
        "wqkv_t": jnp.concatenate([wq_t, wk_t, wv_t], axis=1).astype(jnp.bfloat16),
        "bqkv": jnp.concatenate([bq, bk, bv])[None, :].astype(jnp.float32),
        "wo_t": p["out_w"].T.astype(jnp.bfloat16), "bo": p["out_b"][None, :],
        "wf1x_t": f1_t[:D, :].astype(jnp.bfloat16),
        "wf1m_t": f1_t[D:, :].astype(jnp.bfloat16),
        "bf1": p["f1_b"][None, :],
        "lnw": p["ln_w"][None, :], "lnb": p["ln_b"][None, :],
        "wf2_t": p["f2_w"].T.astype(jnp.bfloat16), "bf2": p["f2_b"][None, :],
    }


# ------------------------- pure-JAX reference (PyTorch semantics, f32) ------

def reference_forward_single(x, mask, p, H):
    B, N, D = x.shape
    hd = D // H
    qkv = x @ p["Wqkv_w"].T + p["Wqkv_b"]                          # [B,N,3D]
    qkv = qkv.reshape(B, N, H, hd, 3).transpose(0, 2, 1, 3, 4)     # [B,H,N,hd,3]
    q, k, v = qkv[..., 0], qkv[..., 1], qkv[..., 2]
    maskT = jnp.swapaxes(mask[:, None], -1, -2)                    # [B,1,N,N]
    s = jnp.einsum('bhid,bhjd->bhij', q, k) / jnp.sqrt(jnp.float32(hd))
    s = jnp.where(maskT, s, jnp.finfo(jnp.float32).min)
    attn = jax.nn.softmax(s, axis=-1)
    ctx = jnp.einsum('bhij,bhjd->bhid', attn, v)
    ctx = ctx.transpose(0, 2, 1, 3).reshape(B, N, D)
    msg = ctx @ p["out_w"].T + p["out_b"]
    cat = jnp.concatenate([x, msg], -1)
    h1 = cat @ p["f1_w"].T + p["f1_b"]
    mu = h1.mean(-1, keepdims=True)
    var = ((h1 - mu) ** 2).mean(-1, keepdims=True)
    ln = (h1 - mu) / jnp.sqrt(var + 1e-5) * p["ln_w"] + p["ln_b"]
    g = 0.5 * ln * (1.0 + jax.lax.erf(ln / jnp.sqrt(jnp.float32(2.0))))
    return x + g @ p["f2_w"].T + p["f2_b"]


if __name__ == "__main__":
    B, N, D, H = 2, 8, 32, 4

    key = jax.random.PRNGKey(0)
    k_x0, k_x1, k_m0, k_m1, k_par = jax.random.split(key, 5)

    x0 = jax.random.normal(k_x0, (B, N, D), jnp.float32)
    x1 = jax.random.normal(k_x1, (B, N, D), jnp.float32)
    eye = jnp.eye(N, dtype=bool)[None]
    mask0 = jax.random.bernoulli(k_m0, 0.7, (B, N, N)) | eye   # bool, diag kept valid
    mask1 = jax.random.bernoulli(k_m1, 0.7, (B, N, N)) | eye

    torch_params = init_torch_style_params(k_par, D)
    kernel_params = to_kernel_params(torch_params, D, H)

    # block_b = B: whole batch in one grid step at these tiny shapes
    y0, y1 = transformer_forward(x0, x1, mask0, mask1, kernel_params, H, block_b=B)
    y0 = jax.block_until_ready(y0)
    y1 = jax.block_until_ready(y1)

    r0 = reference_forward_single(x0, mask0, torch_params, H)
    r1 = reference_forward_single(x1, mask1, torch_params, H)

    # bf16 weights / matmul inputs vs the pure-f32 reference → loosened tolerance
    assert jnp.allclose(y0, r0, atol=8e-2, rtol=5e-2), "x0 branch mismatch"
    assert jnp.allclose(y1, r1, atol=8e-2, rtol=5e-2), "x1 branch mismatch"

    # TODO(synk): torch.backends.cuda.sdp_kernel backend selection has no TPU
    # equivalent; SDPA math is implemented directly (additive-bias masking +
    # stable softmax).  Fully-masked rows yield a uniform distribution rather
    # than PyTorch's NaN.
    print("KERNEL_OK")
</pallas_src>

<mosaic_0001>
module attributes {stable_mosaic.version = 11 : i64} {
  func.func @_transformer_kernel(%arg0: i32, %arg1: memref<2x8x32xf32, #tpu.memory_space<vmem>>, %arg2: memref<2x8x8xbf16, #tpu.memory_space<vmem>>, %arg3: memref<32x96xbf16, #tpu.memory_space<vmem>>, %arg4: memref<1x96xf32, #tpu.memory_space<vmem>>, %arg5: memref<32x32xbf16, #tpu.memory_space<vmem>>, %arg6: memref<1x32xf32, #tpu.memory_space<vmem>>, %arg7: memref<32x64xbf16, #tpu.memory_space<vmem>>, %arg8: memref<32x64xbf16, #tpu.memory_space<vmem>>, %arg9: memref<1x64xf32, #tpu.memory_space<vmem>>, %arg10: memref<1x64xf32, #tpu.memory_space<vmem>>, %arg11: memref<1x64xf32, #tpu.memory_space<vmem>>, %arg12: memref<64x32xbf16, #tpu.memory_space<vmem>>, %arg13: memref<1x32xf32, #tpu.memory_space<vmem>>, %arg14: memref<2x8x32xf32, #tpu.memory_space<vmem>>) attributes {dimension_semantics = [#tpu.dimension_semantics<parallel>], iteration_bounds = array<i64: 1>, scalar_prefetch = 0 : i64, scratch_operands = 0 : i64, tpu.core_type = #tpu.core_type<tc>, window_params = [{transform_indices = @transform_0, window_bounds = array<i64: 2, 8, 32>}, {transform_indices = @transform_1, window_bounds = array<i64: 2, 8, 8>}, {pipeline_mode = #tpu.pipeline_mode<synchronous>, transform_indices = @transform_2, window_bounds = array<i64: 32, 96>}, {pipeline_mode = #tpu.pipeline_mode<synchronous>, transform_indices = @transform_3, window_bounds = array<i64: 1, 96>}, {pipeline_mode = #tpu.pipeline_mode<synchronous>, transform_indices = @transform_4, window_bounds = array<i64: 32, 32>}, {pipeline_mode = #tpu.pipeline_mode<synchronous>, transform_indices = @transform_5, window_bounds = array<i64: 1, 32>}, {pipeline_mode = #tpu.pipeline_mode<synchronous>, transform_indices = @transform_6, window_bounds = array<i64: 32, 64>}, {pipeline_mode = #tpu.pipeline_mode<synchronous>, transform_indices = @transform_7, window_bounds = array<i64: 32, 64>}, {pipeline_mode = #tpu.pipeline_mode<synchronous>, transform_indices = @transform_8, window_bounds = array<i64: 1, 64>}, {pipeline_mode = #tpu.pipeline_mode<synchronous>, transform_indices = @transform_9, window_bounds = array<i64: 1, 64>}, {pipeline_mode = #tpu.pipeline_mode<synchronous>, transform_indices = @transform_10, window_bounds = array<i64: 1, 64>}, {pipeline_mode = #tpu.pipeline_mode<synchronous>, transform_indices = @transform_11, window_bounds = array<i64: 64, 32>}, {pipeline_mode = #tpu.pipeline_mode<synchronous>, transform_indices = @transform_12, window_bounds = array<i64: 1, 32>}, {transform_indices = @transform_13, window_bounds = array<i64: 2, 8, 32>}]} {
    %c0 = arith.constant 0 : index
    %c0_0 = arith.constant 0 : index
    %c0_1 = arith.constant 0 : index
    %0 = vector.load %arg1[%c0, %c0_0, %c0_1] : memref<2x8x32xf32, #tpu.memory_space<vmem>>, vector<2x8x32xf32>
    %1 = vector.shape_cast %0 : vector<2x8x32xf32> to vector<16x32xf32>
    %2 = arith.truncf %1 : vector<16x32xf32> to vector<16x32xbf16>
    %c0_2 = arith.constant 0 : index
    %c0_3 = arith.constant 0 : index
    %c0_4 = arith.constant 0 : index
    %3 = vector.load %arg2[%c0_2, %c0_3, %c0_4] : memref<2x8x8xbf16, #tpu.memory_space<vmem>>, vector<2x8x8xbf16>
    %4 = arith.extf %3 : vector<2x8x8xbf16> to vector<2x8x8xf32>
    %c0_5 = arith.constant 0 : index
    %c0_6 = arith.constant 0 : index
    %5 = vector.load %arg3[%c0_5, %c0_6] : memref<32x96xbf16, #tpu.memory_space<vmem>>, vector<32x96xbf16>
    %cst = arith.constant dense<0.000000e+00> : vector<16x96xf32>
    %6 = tpu.matmul %2, %5, %cst {dimension_numbers = #tpu.dot_dimension_numbers<[1], [0], [0], [1], [0, 0, 1, 1], [], []>} : vector<16x32xbf16>, vector<32x96xbf16>, vector<16x96xf32> -> vector<16x96xf32>
    %c0_7 = arith.constant 0 : index
    %c0_8 = arith.constant 0 : index
    %7 = vector.load %arg4[%c0_7, %c0_8] : memref<1x96xf32, #tpu.memory_space<vmem>>, vector<1x96xf32>
    %8 = vector.broadcast %7 : vector<1x96xf32> to vector<16x96xf32>
    %9 = arith.addf %6, %8 : vector<16x96xf32>
    %10 = vector.shape_cast %9 : vector<16x96xf32> to vector<2x8x96xf32>
    %11 = vector.extract_strided_slice %10 {offsets = [0, 0, 0], sizes = [2, 8, 8], strides = [1, 1, 1]} : vector<2x8x96xf32> to vector<2x8x8xf32>
    %12 = arith.truncf %11 : vector<2x8x8xf32> to vector<2x8x8xbf16>
    %13 = vector.extract_strided_slice %10 {offsets = [0, 0, 32], sizes = [2, 8, 8], strides = [1, 1, 1]} : vector<2x8x96xf32> to vector<2x8x8xf32>
    %14 = arith.truncf %13 : vector<2x8x8xf32> to vector<2x8x8xbf16>
    %15 = vector.extract_strided_slice %10 {offsets = [0, 0, 64], sizes = [2, 8, 8], strides = [1, 1, 1]} : vector<2x8x96xf32> to vector<2x8x8xf32>
    %16 = arith.truncf %15 : vector<2x8x8xf32> to vector<2x8x8xbf16>
    "tpu.trace_start"() <{level = 10 : i32, message = "bqd,bkd->bqk"}> : () -> ()
    %cst_9 = arith.constant dense<0.000000e+00> : vector<2x8x8xf32>
    %17 = tpu.matmul %12, %14, %cst_9 {dimension_numbers = #tpu.dot_dimension_numbers<[2], [2], [1], [1], [0, 0, 0, 1, 1, 1], [0], [0]>} : vector<2x8x8xbf16>, vector<2x8x8xbf16>, vector<2x8x8xf32> -> vector<2x8x8xf32>
    "tpu.trace_stop"() : () -> ()
    %18 = arith.addf %17, %4 : vector<2x8x8xf32>
    %cst_10 = arith.constant dense<0xFF800000> : vector<2x8xf32>
    %19 = vector.multi_reduction <maximumf>, %18, %cst_10 [2] : vector<2x8x8xf32> to vector<2x8xf32>
    %20 = vector.shape_cast %19 : vector<2x8xf32> to vector<2x8x1xf32>
    %21 = vector.broadcast %20 : vector<2x8x1xf32> to vector<2x8x8xf32>
    %22 = arith.subf %18, %21 : vector<2x8x8xf32>
    %23 = math.exp %22 : vector<2x8x8xf32>
    %cst_11 = arith.constant dense<0.000000e+00> : vector<2x8xf32>
    %24 = vector.multi_reduction <add>, %23, %cst_11 [2] : vector<2x8x8xf32> to vector<2x8xf32>
    %25 = vector.shape_cast %24 : vector<2x8xf32> to vector<2x8x1xf32>
    %26 = arith.truncf %23 : vector<2x8x8xf32> to vector<2x8x8xbf16>
    "tpu.trace_start"() <{level = 10 : i32, message = "bqk,bkd->bqd"}> : () -> ()
    %cst_12 = arith.constant dense<0.000000e+00> : vector<2x8x8xf32>
    %27 = tpu.matmul %26, %16, %cst_12 {dimension_numbers = #tpu.dot_dimension_numbers<[2], [1], [1], [2], [0, 0, 0, 1, 1, 2], [0], [0]>} : vector<2x8x8xbf16>, vector<2x8x8xbf16>, vector<2x8x8xf32> -> vector<2x8x8xf32>
    "tpu.trace_stop"() : () -> ()
    %28 = tpu.reciprocal %25 {approx = true} : vector<2x8x1xf32> -> vector<2x8x1xf32>
    %29 = vector.broadcast %28 : vector<2x8x1xf32> to vector<2x8x8xf32>
    %30 = arith.mulf %27, %29 : vector<2x8x8xf32>
    %31 = vector.extract_strided_slice %10 {offsets = [0, 0, 8], sizes = [2, 8, 8], strides = [1, 1, 1]} : vector<2x8x96xf32> to vector<2x8x8xf32>
    %32 = arith.truncf %31 : vector<2x8x8xf32> to vector<2x8x8xbf16>
    %33 = vector.extract_strided_slice %10 {offsets = [0, 0, 40], sizes = [2, 8, 8], strides = [1, 1, 1]} : vector<2x8x96xf32> to vector<2x8x8xf32>
    %34 = arith.truncf %33 : vector<2x8x8xf32> to vector<2x8x8xbf16>
    %35 = vector.extract_strided_slice %10 {offsets = [0, 0, 72], sizes = [2, 8, 8], strides = [1, 1, 1]} : vector<2x8x96xf32> to vector<2x8x8xf32>
    %36 = arith.truncf %35 : vector<2x8x8xf32> to vector<2x8x8xbf16>
    "tpu.trace_start"() <{level = 10 : i32, message = "bqd,bkd->bqk"}> : () -> ()
    %cst_13 = arith.constant dense<0.000000e+00> : vector<2x8x8xf32>
    %37 = tpu.matmul %32, %34, %cst_13 {dimension_numbers = #tpu.dot_dimension_numbers<[2], [2], [1], [1], [0, 0, 0, 1, 1, 1], [0], [0]>} : vector<2x8x8xbf16>, vector<2x8x8xbf16>, vector<2x8x8xf32> -> vector<2x8x8xf32>
    "tpu.trace_stop"() : () -> ()
    %38 = arith.addf %37, %4 : vector<2x8x8xf32>
    %cst_14 = arith.constant dense<0xFF800000> : vector<2x8xf32>
    %39 = vector.multi_reduction <maximumf>, %38, %cst_14 [2] : vector<2x8x8xf32> to vector<2x8xf32>
    %40 = vector.shape_cast %39 : vector<2x8xf32> to vector<2x8x1xf32>
    %41 = vector.broadcast %40 : vector<2x8x1xf32> to vector<2x8x8xf32>
    %42 = arith.subf %38, %41 : vector<2x8x8xf32>
    %43 = math.exp %42 : vector<2x8x8xf32>
    %cst_15 = arith.constant dense<0.000000e+00> : vector<2x8xf32>
    %44 = vector.multi_reduction <add>, %43, %cst_15 [2] : vector<2x8x8xf32> to vector<2x8xf32>
    %45 = vector.shape_cast %44 : vector<2x8xf32> to vector<2x8x1xf32>
    %46 = arith.truncf %43 : vector<2x8x8xf32> to vector<2x8x8xbf16>
    "tpu.trace_start"() <{level = 10 : i32, message = "bqk,bkd->bqd"}> : () -> ()
    %cst_16 = arith.constant dense<0.000000e+00> : vector<2x8x8xf32>
    %47 = tpu.matmul %46, %36, %cst_16 {dimension_numbers = #tpu.dot_dimension_numbers<[2], [1], [1], [2], [0, 0, 0, 1, 1, 2], [0], [0]>} : vector<2x8x8xbf16>, vector<2x8x8xbf16>, vector<2x8x8xf32> -> vector<2x8x8xf32>
    "tpu.trace_stop"() : () -> ()
    %48 = tpu.reciprocal %45 {approx = true} : vector<2x8x1xf32> -> vector<2x8x1xf32>
    %49 = vector.broadcast %48 : vector<2x8x1xf32> to vector<2x8x8xf32>
    %50 = arith.mulf %47, %49 : vector<2x8x8xf32>
    %51 = vector.extract_strided_slice %10 {offsets = [0, 0, 16], sizes = [2, 8, 8], strides = [1, 1, 1]} : vector<2x8x96xf32> to vector<2x8x8xf32>
    %52 = arith.truncf %51 : vector<2x8x8xf32> to vector<2x8x8xbf16>
    %53 = vector.extract_strided_slice %10 {offsets = [0, 0, 48], sizes = [2, 8, 8], strides = [1, 1, 1]} : vector<2x8x96xf32> to vector<2x8x8xf32>
    %54 = arith.truncf %53 : vector<2x8x8xf32> to vector<2x8x8xbf16>
    %55 = vector.extract_strided_slice %10 {offsets = [0, 0, 80], sizes = [2, 8, 8], strides = [1, 1, 1]} : vector<2x8x96xf32> to vector<2x8x8xf32>
    %56 = arith.truncf %55 : vector<2x8x8xf32> to vector<2x8x8xbf16>
    "tpu.trace_start"() <{level = 10 : i32, message = "bqd,bkd->bqk"}> : () -> ()
    %cst_17 = arith.constant dense<0.000000e+00> : vector<2x8x8xf32>
    %57 = tpu.matmul %52, %54, %cst_17 {dimension_numbers = #tpu.dot_dimension_numbers<[2], [2], [1], [1], [0, 0, 0, 1, 1, 1], [0], [0]>} : vector<2x8x8xbf16>, vector<2x8x8xbf16>, vector<2x8x8xf32> -> vector<2x8x8xf32>
    "tpu.trace_stop"() : () -> ()
    %58 = arith.addf %57, %4 : vector<2x8x8xf32>
    %cst_18 = arith.constant dense<0xFF800000> : vector<2x8xf32>
    %59 = vector.multi_reduction <maximumf>, %58, %cst_18 [2] : vector<2x8x8xf32> to vector<2x8xf32>
    %60 = vector.shape_cast %59 : vector<2x8xf32> to vector<2x8x1xf32>
    %61 = vector.broadcast %60 : vector<2x8x1xf32> to vector<2x8x8xf32>
    %62 = arith.subf %58, %61 : vector<2x8x8xf32>
    %63 = math.exp %62 : vector<2x8x8xf32>
    %cst_19 = arith.constant dense<0.000000e+00> : vector<2x8xf32>
    %64 = vector.multi_reduction <add>, %63, %cst_19 [2] : vector<2x8x8xf32> to vector<2x8xf32>
    %65 = vector.shape_cast %64 : vector<2x8xf32> to vector<2x8x1xf32>
    %66 = arith.truncf %63 : vector<2x8x8xf32> to vector<2x8x8xbf16>
    "tpu.trace_start"() <{level = 10 : i32, message = "bqk,bkd->bqd"}> : () -> ()
    %cst_20 = arith.constant dense<0.000000e+00> : vector<2x8x8xf32>
    %67 = tpu.matmul %66, %56, %cst_20 {dimension_numbers = #tpu.dot_dimension_numbers<[2], [1], [1], [2], [0, 0, 0, 1, 1, 2], [0], [0]>} : vector<2x8x8xbf16>, vector<2x8x8xbf16>, vector<2x8x8xf32> -> vector<2x8x8xf32>
    "tpu.trace_stop"() : () -> ()
    %68 = tpu.reciprocal %65 {approx = true} : vector<2x8x1xf32> -> vector<2x8x1xf32>
    %69 = vector.broadcast %68 : vector<2x8x1xf32> to vector<2x8x8xf32>
    %70 = arith.mulf %67, %69 : vector<2x8x8xf32>
    %71 = vector.extract_strided_slice %10 {offsets = [0, 0, 24], sizes = [2, 8, 8], strides = [1, 1, 1]} : vector<2x8x96xf32> to vector<2x8x8xf32>
    %72 = arith.truncf %71 : vector<2x8x8xf32> to vector<2x8x8xbf16>
    %73 = vector.extract_strided_slice %10 {offsets = [0, 0, 56], sizes = [2, 8, 8], strides = [1, 1, 1]} : vector<2x8x96xf32> to vector<2x8x8xf32>
    %74 = arith.truncf %73 : vector<2x8x8xf32> to vector<2x8x8xbf16>
    %75 = vector.extract_strided_slice %10 {offsets = [0, 0, 88], sizes = [2, 8, 8], strides = [1, 1, 1]} : vector<2x8x96xf32> to vector<2x8x8xf32>
    %76 = arith.truncf %75 : vector<2x8x8xf32> to vector<2x8x8xbf16>
    "tpu.trace_start"() <{level = 10 : i32, message = "bqd,bkd->bqk"}> : () -> ()
    %cst_21 = arith.constant dense<0.000000e+00> : vector<2x8x8xf32>
    %77 = tpu.matmul %72, %74, %cst_21 {dimension_numbers = #tpu.dot_dimension_numbers<[2], [2], [1], [1], [0, 0, 0, 1, 1, 1], [0], [0]>} : vector<2x8x8xbf16>, vector<2x8x8xbf16>, vector<2x8x8xf32> -> vector<2x8x8xf32>
    "tpu.trace_stop"() : () -> ()
    %78 = arith.addf %77, %4 : vector<2x8x8xf32>
    %cst_22 = arith.constant dense<0xFF800000> : vector<2x8xf32>
    %79 = vector.multi_reduction <maximumf>, %78, %cst_22 [2] : vector<2x8x8xf32> to vector<2x8xf32>
    %80 = vector.shape_cast %79 : vector<2x8xf32> to vector<2x8x1xf32>
    %81 = vector.broadcast %80 : vector<2x8x1xf32> to vector<2x8x8xf32>
    %82 = arith.subf %78, %81 : vector<2x8x8xf32>
    %83 = math.exp %82 : vector<2x8x8xf32>
    %cst_23 = arith.constant dense<0.000000e+00> : vector<2x8xf32>
    %84 = vector.multi_reduction <add>, %83, %cst_23 [2] : vector<2x8x8xf32> to vector<2x8xf32>
    %85 = vector.shape_cast %84 : vector<2x8xf32> to vector<2x8x1xf32>
    %86 = arith.truncf %83 : vector<2x8x8xf32> to vector<2x8x8xbf16>
    "tpu.trace_start"() <{level = 10 : i32, message = "bqk,bkd->bqd"}> : () -> ()
    %cst_24 = arith.constant dense<0.000000e+00> : vector<2x8x8xf32>
    %87 = tpu.matmul %86, %76, %cst_24 {dimension_numbers = #tpu.dot_dimension_numbers<[2], [1], [1], [2], [0, 0, 0, 1, 1, 2], [0], [0]>} : vector<2x8x8xbf16>, vector<2x8x8xbf16>, vector<2x8x8xf32> -> vector<2x8x8xf32>
    "tpu.trace_stop"() : () -> ()
    %88 = tpu.reciprocal %85 {approx = true} : vector<2x8x1xf32> -> vector<2x8x1xf32>
    %89 = vector.broadcast %88 : vector<2x8x1xf32> to vector<2x8x8xf32>
    %90 = arith.mulf %87, %89 : vector<2x8x8xf32>
    %91 = tpu.concatenate %30, %50, %70, %90 in 2 : vector<2x8x8xf32>, vector<2x8x8xf32>, vector<2x8x8xf32>, vector<2x8x8xf32> -> vector<2x8x32xf32>
    %92 = vector.shape_cast %91 : vector<2x8x32xf32> to vector<16x32xf32>
    %93 = arith.truncf %92 : vector<16x32xf32> to vector<16x32xbf16>
    %c0_25 = arith.constant 0 : index
    %c0_26 = arith.constant 0 : index
    %94 = vector.load %arg5[%c0_25, %c0_26] : memref<32x32xbf16, #tpu.memory_space<vmem>>, vector<32x32xbf16>
    %cst_27 = arith.constant dense<0.000000e+00> : vector<16x32xf32>
    %95 = tpu.matmul %93, %94, %cst_27 {dimension_numbers = #tpu.dot_dimension_numbers<[1], [0], [0], [1], [0, 0, 1, 1], [], []>} : vector<16x32xbf16>, vector<32x32xbf16>, vector<16x32xf32> -> vector<16x32xf32>
    %c0_28 = arith.constant 0 : index
    %c0_29 = arith.constant 0 : index
    %96 = vector.load %arg6[%c0_28, %c0_29] : memref<1x32xf32, #tpu.memory_space<vmem>>, vector<1x32xf32>
    %97 = vector.broadcast %96 : vector<1x32xf32> to vector<16x32xf32>
    %98 = arith.addf %95, %97 : vector<16x32xf32>
    %99 = arith.truncf %98 : vector<16x32xf32> to vector<16x32xbf16>
    %c0_30 = arith.constant 0 : index
    %c0_31 = arith.constant 0 : index
    %100 = vector.load %arg7[%c0_30, %c0_31] : memref<32x64xbf16, #tpu.memory_space<vmem>>, vector<32x64xbf16>
    %cst_32 = arith.constant dense<0.000000e+00> : vector<16x64xf32>
    %101 = tpu.matmul %2, %100, %cst_32 {dimension_numbers = #tpu.dot_dimension_numbers<[1], [0], [0], [1], [0, 0, 1, 1], [], []>} : vector<16x32xbf16>, vector<32x64xbf16>, vector<16x64xf32> -> vector<16x64xf32>
    %c0_33 = arith.constant 0 : index
    %c0_34 = arith.constant 0 : index
    %102 = vector.load %arg8[%c0_33, %c0_34] : memref<32x64xbf16, #tpu.memory_space<vmem>>, vector<32x64xbf16>
    %cst_35 = arith.constant dense<0.000000e+00> : vector<16x64xf32>
    %103 = tpu.matmul %99, %102, %cst_35 {dimension_numbers = #tpu.dot_dimension_numbers<[1], [0], [0], [1], [0, 0, 1, 1], [], []>} : vector<16x32xbf16>, vector<32x64xbf16>, vector<16x64xf32> -> vector<16x64xf32>
    %104 = arith.addf %101, %103 : vector<16x64xf32>
    %c0_36 = arith.constant 0 : index
    %c0_37 = arith.constant 0 : index
    %105 = vector.load %arg9[%c0_36, %c0_37] : memref<1x64xf32, #tpu.memory_space<vmem>>, vector<1x64xf32>
    %106 = vector.broadcast %105 : vector<1x64xf32> to vector<16x64xf32>
    %107 = arith.addf %104, %106 : vector<16x64xf32>
    %cst_38 = arith.constant dense<0.000000e+00> : vector<16xf32>
    %108 = vector.multi_reduction <add>, %107, %cst_38 [1] : vector<16x64xf32> to vector<16xf32>
    %109 = vector.shape_cast %108 : vector<16xf32> to vector<16x1xf32>
    %cst_39 = arith.constant 6.400000e+01 : f32
    %110 = vector.broadcast %cst_39 : f32 to vector<16x1xf32>
    %111 = arith.divf %109, %110 : vector<16x1xf32>
    %112 = vector.broadcast %111 : vector<16x1xf32> to vector<16x64xf32>
    %113 = arith.subf %107, %112 : vector<16x64xf32>
    %114 = arith.mulf %113, %113 : vector<16x64xf32>
    %cst_40 = arith.constant dense<0.000000e+00> : vector<16xf32>
    %115 = vector.multi_reduction <add>, %114, %cst_40 [1] : vector<16x64xf32> to vector<16xf32>
    %116 = vector.shape_cast %115 : vector<16xf32> to vector<16x1xf32>
    %cst_41 = arith.constant 6.400000e+01 : f32
    %117 = vector.broadcast %cst_41 : f32 to vector<16x1xf32>
    %118 = arith.divf %116, %117 : vector<16x1xf32>
    %119 = vector.broadcast %111 : vector<16x1xf32> to vector<16x64xf32>
    %120 = arith.subf %107, %119 : vector<16x64xf32>
    %cst_42 = arith.constant 9.99999974E-6 : f32
    %121 = vector.broadcast %cst_42 : f32 to vector<16x1xf32>
    %122 = arith.addf %118, %121 : vector<16x1xf32>
    %123 = math.rsqrt %122 : vector<16x1xf32>
    %124 = vector.broadcast %123 : vector<16x1xf32> to vector<16x64xf32>
    %125 = arith.mulf %120, %124 : vector<16x64xf32>
    %c0_43 = arith.constant 0 : index
    %c0_44 = arith.constant 0 : index
    %126 = vector.load %arg10[%c0_43, %c0_44] : memref<1x64xf32, #tpu.memory_space<vmem>>, vector<1x64xf32>
    %127 = vector.broadcast %126 : vector<1x64xf32> to vector<16x64xf32>
    %128 = arith.mulf %125, %127 : vector<16x64xf32>
    %c0_45 = arith.constant 0 : index
    %c0_46 = arith.constant 0 : index
    %129 = vector.load %arg11[%c0_45, %c0_46] : memref<1x64xf32, #tpu.memory_space<vmem>>, vector<1x64xf32>
    %130 = vector.broadcast %129 : vector<1x64xf32> to vector<16x64xf32>
    %131 = arith.addf %128, %130 : vector<16x64xf32>
    %cst_47 = arith.constant 5.000000e-01 : f32
    %132 = vector.broadcast %cst_47 : f32 to vector<16x64xf32>
    %133 = arith.mulf %132, %131 : vector<16x64xf32>
    %cst_48 = arith.constant 0.707106769 : f32
    %134 = vector.broadcast %cst_48 : f32 to vector<16x64xf32>
    %135 = arith.mulf %131, %134 : vector<16x64xf32>
    %136 = math.erf %135 : vector<16x64xf32>
    %cst_49 = arith.constant 1.000000e+00 : f32
    %137 = vector.broadcast %cst_49 : f32 to vector<16x64xf32>
    %138 = arith.addf %137, %136 : vector<16x64xf32>
    %139 = arith.mulf %133, %138 : vector<16x64xf32>
    %140 = arith.truncf %139 : vector<16x64xf32> to vector<16x64xbf16>
    %c0_50 = arith.constant 0 : index
    %c0_51 = arith.constant 0 : index
    %141 = vector.load %arg12[%c0_50, %c0_51] : memref<64x32xbf16, #tpu.memory_space<vmem>>, vector<64x32xbf16>
    %cst_52 = arith.constant dense<0.000000e+00> : vector<16x32xf32>
    %142 = tpu.matmul %140, %141, %cst_52 {dimension_numbers = #tpu.dot_dimension_numbers<[1], [0], [0], [1], [0, 0, 1, 1], [], []>} : vector<16x64xbf16>, vector<64x32xbf16>, vector<16x32xf32> -> vector<16x32xf32>
    %c0_53 = arith.constant 0 : index
    %c0_54 = arith.constant 0 : index
    %143 = vector.load %arg13[%c0_53, %c0_54] : memref<1x32xf32, #tpu.memory_space<vmem>>, vector<1x32xf32>
    %144 = vector.broadcast %143 : vector<1x32xf32> to vector<16x32xf32>
    %145 = arith.addf %142, %144 : vector<16x32xf32>
    %146 = vector.shape_cast %145 : vector<16x32xf32> to vector<2x8x32xf32>
    %147 = arith.addf %0, %146 : vector<2x8x32xf32>
    %c0_55 = arith.constant 0 : index
    %c0_56 = arith.constant 0 : index
    %c0_57 = arith.constant 0 : index
    %148 = vector.load %arg14[%c0_55, %c0_56, %c0_57] : memref<2x8x32xf32, #tpu.memory_space<vmem>>, vector<2x8x32xf32>
    tpu.vector_store %arg14[%c0_55, %c0_56, %c0_57], %147 {strides = array<i32>} : memref<2x8x32xf32, #tpu.memory_space<vmem>>, vector<2x8x32xf32>,
    return
  }
  func.func @transform_0(%arg0: i32) -> (i32, i32, i32) {
    %c0_i32 = arith.constant 0 : i32
    %c0_i32_0 = arith.constant 0 : i32
    %c0_i32_1 = arith.constant 0 : i32
    return %arg0, %c0_i32, %c0_i32_0 : i32, i32, i32
  }
  func.func @transform_1(%arg0: i32) -> (i32, i32, i32) {
    %c0_i32 = arith.constant 0 : i32
    %c0_i32_0 = arith.constant 0 : i32
    %c0_i32_1 = arith.constant 0 : i32
    return %arg0, %c0_i32, %c0_i32_0 : i32, i32, i32
  }
  func.func @transform_2(%arg0: i32) -> (i32, i32) {
    %c0_i32 = arith.constant 0 : i32
    %c0_i32_0 = arith.constant 0 : i32
    %c0_i32_1 = arith.constant 0 : i32
    return %c0_i32, %c0_i32_0 : i32, i32
  }
  func.func @transform_3(%arg0: i32) -> (i32, i32) {
    %c0_i32 = arith.constant 0 : i32
    %c0_i32_0 = arith.constant 0 : i32
    %c0_i32_1 = arith.constant 0 : i32
    return %c0_i32, %c0_i32_0 : i32, i32
  }
  func.func @transform_4(%arg0: i32) -> (i32, i32) {
    %c0_i32 = arith.constant 0 : i32
    %c0_i32_0 = arith.constant 0 : i32
    %c0_i32_1 = arith.constant 0 : i32
    return %c0_i32, %c0_i32_0 : i32, i32
  }
  func.func @transform_5(%arg0: i32) -> (i32, i32) {
    %c0_i32 = arith.constant 0 : i32
    %c0_i32_0 = arith.constant 0 : i32
    %c0_i32_1 = arith.constant 0 : i32
    return %c0_i32, %c0_i32_0 : i32, i32
  }
  func.func @transform_6(%arg0: i32) -> (i32, i32) {
    %c0_i32 = arith.constant 0 : i32
    %c0_i32_0 = arith.constant 0 : i32
    %c0_i32_1 = arith.constant 0 : i32
    return %c0_i32, %c0_i32_0 : i32, i32
  }
  func.func @transform_7(%arg0: i32) -> (i32, i32) {
    %c0_i32 = arith.constant 0 : i32
    %c0_i32_0 = arith.constant 0 : i32
    %c0_i32_1 = arith.constant 0 : i32
    return %c0_i32, %c0_i32_0 : i32, i32
  }
  func.func @transform_8(%arg0: i32) -> (i32, i32) {
    %c0_i32 = arith.constant 0 : i32
    %c0_i32_0 = arith.constant 0 : i32
    %c0_i32_1 = arith.constant 0 : i32
    return %c0_i32, %c0_i32_0 : i32, i32
  }
  func.func @transform_9(%arg0: i32) -> (i32, i32) {
    %c0_i32 = arith.constant 0 : i32
    %c0_i32_0 = arith.constant 0 : i32
    %c0_i32_1 = arith.constant 0 : i32
    return %c0_i32, %c0_i32_0 : i32, i32
  }
  func.func @transform_10(%arg0: i32) -> (i32, i32) {
    %c0_i32 = arith.constant 0 : i32
    %c0_i32_0 = arith.constant 0 : i32
    %c0_i32_1 = arith.constant 0 : i32
    return %c0_i32, %c0_i32_0 : i32, i32
  }
  func.func @transform_11(%arg0: i32) -> (i32, i32) {
    %c0_i32 = arith.constant 0 : i32
    %c0_i32_0 = arith.constant 0 : i32
    %c0_i32_1 = arith.constant 0 : i32
    return %c0_i32, %c0_i32_0 : i32, i32
  }
  func.func @transform_12(%arg0: i32) -> (i32, i32) {
    %c0_i32 = arith.constant 0 : i32
    %c0_i32_0 = arith.constant 0 : i32
    %c0_i32_1 = arith.constant 0 : i32
    return %c0_i32, %c0_i32_0 : i32, i32
  }
  func.func @transform_13(%arg0: i32) -> (i32, i32, i32) {
    %c0_i32 = arith.constant 0 : i32
    %c0_i32_0 = arith.constant 0 : i32
    %c0_i32_1 = arith.constant 0 : i32
    return %arg0, %c0_i32, %c0_i32_0 : i32, i32, i32
  }
}

</mosaic_0001>

<bundles_post_ra>
// kernel: tpu_custom_call.1
= control target key start
LH: loop header
LB: loop body
LE: loop exit
PB: predicated region body
PF: predicated region fallthrough
CT: control target
= control target key end

     0   :  { %18 = vsyncpa [#allocation3], 0  ;;  %s2260_s0 = inlined_call_operand.vmem [shape: f32[2,8,32], index: 0, kind: input, shape index: {}]   ;;  %s2261_s1 = inlined_call_operand.hbm [shape: bf16[2,8,8], index: 1, kind: input, shape index: {}]   ;;  %s2262_s2 = inlined_call_operand.vmem [shape: bf16[32,96], index: 2, kind: input, shape index: {}]   ;;  %s2263_s3 = inlined_call_operand.vmem [shape: f32[1,96], index: 3, kind: input, shape index: {}]   ;;  %s2264_s4 = inlined_call_operand.vmem [shape: bf16[32,32], index: 4, kind: input, shape index: {}]   ;;  %s2265_s5 = inlined_call_operand.vmem [shape: f32[1,32], index: 5, kind: input, shape index: {}]   ;;  %s2266_s6 = inlined_call_operand.hbm [shape: bf16[32,64], index: 6, kind: input, shape index: {}]   ;;  %s2267_s7 = inlined_call_operand.hbm [shape: bf16[32,64], index: 7, kind: input, shape index: {}]   ;;  %s2268_s8 = inlined_call_operand.vmem [shape: f32[1,64], index: 8, kind: input, shape index: {}]   ;;  %s2269_s9 = inlined_call_operand.vmem [shape: f32[1,64], index: 9, kind: input, shape index: {}]   ;;  %s2270_s10 = inlined_call_operand.hbm [shape: f32[1,64], index: 10, kind: input, shape index: {}]   ;;  %s2271_s11 = inlined_call_operand.vmem [shape: bf16[64,32], index: 11, kind: input, shape index: {}]   ;;  %s2272_s12 = inlined_call_operand.vmem [shape: f32[1,32], index: 12, kind: input, shape index: {}]   ;;  %s2273_s13 = inlined_call_operand.hbm [shape: f32[2,8,32], index: 13, kind: output, shape index: {}]  }
   0x1   :  { %19 = vsyncpa [#allocation6], 0 }
   0x2   :  { %20 = vsyncpa [#allocation9], 0 }
   0x3   :  { %21 = vsyncpa [#allocation4], 0  ;;  %s1876_s25 = smov [#allocation5]   ;;  %s1877_s27 = smov [#allocation2]  }
   0x4   :  { %s49_s26 = sshll.u32 %s1876_s25, 4  ;;  %s29_s28 = sshll.u32 %s1877_s27, 4  ;;  %s50_s26 = int_to_ptr.vmem [resolvable:$true] %s49_s26  ;;  %s30_s28 = int_to_ptr.vmem [resolvable:$true] %s29_s28 }
   0x5   :  { %s1776_s29 = scalar_lea.vmem %s50_s26, 256  ;;  %p1781_p1 = scmp.lt.s32.totalorder %s50_s26, %s50_s26 }
   0x6   :  { %p1777_p0 = scmp.ne.s32.totalorder %s50_s26, %s1776_s29  ;;  %p1782_p2 = scmp.lt.s32.totalorder %s1776_s29, %s1776_s29 }
   0x8   :  { %p1783_p3 = por %p1782_p2, %p1781_p1 }
   0xa   :  { %p1784_p4 = pnand %p1783_p3, %p1777_p0 }
   0xc   :  { %1787 = shalt.err (!%p1784_p4)
}
   0xd   :  { %s1878_s30 = smov 64   ;;  %s1879_s14 = smov 4  }
   0xe   :  { %55 = dma.hbm_to_vmem [thread:$0]  %s2266_s6, 256, %s50_s26, [#allocation6], %s1878_s30, %s1878_s30, %s1879_s14  }
   0xf   :  { %s1796_s17 = scalar_lea.vmem %s30_s28, 128  ;;  %p1801_p6 = scmp.lt.s32.totalorder %s30_s28, %s30_s28 }
  0x10   :  { %p1797_p5 = scmp.ne.s32.totalorder %s30_s28, %s1796_s17  ;;  %p1802_p7 = scmp.lt.s32.totalorder %s1796_s17, %s1796_s17 }
  0x12   :  { %p1803_p8 = por %p1802_p7, %p1801_p6 }
  0x14   :  { %p1804_p9 = pnand %p1803_p8, %p1797_p5 }
  0x16   :  { %1807 = shalt.err (!%p1804_p9)
}
  0x17   :  { %35 = dma.hbm_to_vmem [thread:$0]  %s2261_s1, 128, %s30_s28, [#allocation3], %s1878_s30, %s1878_s30, %s1879_s14  }
  0x18   :  { %s1880_s20 = smov [#allocation7]   ;;  %s1881_s22 = smov [#allocation8]  }
  0x19   :  { %s61_s21 = sshll.u32 %s1880_s20, 4  ;;  %s78_s23 = sshll.u32 %s1881_s22, 4  ;;  %s62_s21 = int_to_ptr.vmem [resolvable:$true] %s61_s21  ;;  %s79_s23 = int_to_ptr.vmem [resolvable:$true] %s78_s23 }
  0x1a   :  { %s1816_s6 = scalar_lea.vmem %s62_s21, 256  ;;  %p1821_p11 = scmp.lt.s32.totalorder %s62_s21, %s62_s21 }
  0x1b   :  { %p1817_p10 = scmp.ne.s32.totalorder %s62_s21, %s1816_s6  ;;  %p1822_p12 = scmp.lt.s32.totalorder %s1816_s6, %s1816_s6 }
  0x1d   :  { %p1823_p13 = por %p1822_p12, %p1821_p11 }
  0x1f   :  { %p1824_p0 = pnand %p1823_p13, %p1817_p10 }
  0x21   :  { %1827 = shalt.err (!%p1824_p0)
}
  0x22   :  { %67 = dma.hbm_to_vmem [thread:$0]  %s2267_s7, 256, %s62_s21, [#allocation6], %s1878_s30, %s1878_s30, %s1879_s14  }
  0x23   :  { %s1836_s1 = scalar_lea.vmem %s79_s23, 16  ;;  %s1840_s26 = scalar_lea.vmem %s79_s23, 32 }
  0x24   :  { %p1837_p1 = scmp.ne.s32.totalorder %s79_s23, %s1836_s1  ;;  %p1841_p2 = scmp.lt.s32.totalorder %s79_s23, %s79_s23 }
  0x25   :  { %p1842_p3 = scmp.lt.s32.totalorder %s1840_s26, %s1836_s1 }
  0x27   :  { %p1843_p4 = por %p1842_p3, %p1841_p2 }
  0x29   :  { %p1844_p5 = pnand %p1843_p4, %p1837_p1 }
  0x2b   :  { %1847 = shalt.err (!%p1844_p5)
}
  0x2c   :  { %81 = dma.hbm_to_vmem [thread:$0]  %s2270_s10, 16, %s79_s23, [#allocation9]  }
  0x2d   :  { %1868 = dma.done.wait [#allocation3], 128  }
  0x2e   :  { %1869 = vsyncadd [#allocation3], 4294967168 }
  0x2f   :  { %1870 = dma.done.wait [#allocation6], 512  }
  0x30   :  { %1871 = vsyncadd [#allocation6], 4294966784 }
  0x31   :  { %1872 = dma.done.wait [#allocation9], 16  }
  0x32   :  { %1873 = vsyncadd [#allocation9], 4294967280  ;;  %v1882_v0 = vmov 0.0   ;;  %vm1883_vm0 = vmmov 0   ;;  %v1716_v1 = vld [vmem:[%s2262_s2 + $0x8] sm:$0xff]   ;;  %v1717_v2 = vld [vmem:[%s2262_s2] sm:$0xff]  }
  0x33   :  { %1538 = vmatprep.subr.bf16.mxu1 %v1882_v0  ;;  %1542 = vmatprep.mubr.msk.bf16.mxu1 %vm1883_vm0, %v1882_v0  ;;  %v2002_v3 = vld [vmem:[%s2260_s0] sm:$0xff]  ;;  %v2007_v4 = vld [vmem:[%s2260_s0 + $0x8] sm:$0xff]  ;;  %vm129_vm1 = vcmask 261120   ;;  %s1884_s0 = smov 96   ;;  %s1885_s20 = smov 88   ;;  %vm179_vm2 = vcmask 64512  }
  0x34   :  { %1552 = vmatprep.subr.bf16.mxu0 %v1882_v0  ;;  %1554 = vmatprep.mubr.msk.bf16.mxu0 %vm1883_vm0, %v1882_v0  ;;  %v2012_v5 = vpack.c.bf16 %v2007_v4, %v2002_v3  ;;  %v1446_v6 = vld [vmem:[%s2263_s3] ss:$0 sm:$0xff]  ;;  %s1886_s3 = smov 120   ;;  %vm300_vm3 = vcmask 1043456   ;;  %s1888_s21 = smov 80   ;;  %vm1082_vm4 = vcmask 130048  }
  0x35   :  { %1539 = vmatpush3.bf16.msra.mxu1 %v1716_v1  ;;  %v1486_v21 = vld [vmem:[#allocation2] sm:$0xff]   ;;  %s1889_s22 = smov 112   ;;  %s1890_s23 = smov 48   ;;  %vm1085_vm5 = vcmask 195584   ;;  %vm1283_vm6 = vcmask 523264  }
  0x36   :  { %1540 = vmatprep.subr.bf16.mxu1 %v1882_v0  ;;  %v2048_v22 = vunpack.c.l.bf16 %v1486_v21  ;;  %v2051_v25 = vunpack.c.h.bf16 %v1486_v21  ;;  %s1891_s6 = smov 72   ;;  %s1892_s24 = smov 104  }
  0x37   :  { %s1893_s25 = smov 40   ;;  %s1894_s1 = smov 8  }
  0x38   :  { %s1895_s26 = smov 16   ;;  %s1896_s29 = smov 24  }
  0x39   :  { %1541 = vmatpush3.bf16.msra.mxu1 %v1717_v2 }
  0x3a   :  { %1546 = vmatprep.subr.bf16.mxu1 %v1882_v0 }
  0x3c   :  { %1543 = vmatmul.mubr.msk.bf16.vlgmr.msra.gmra.mxu1 %vm129_vm1, %v2012_v5 }
  0x3d   :  { %1548 = vmatprep.mubr.msk.bf16.mxu1 %vm1883_vm0, %v1882_v0 }
  0xfc   :  { %v167_v7 = vpop.f32.mrf.mxu1 }
  0xfd   :  { %v168_v8 = vadd.f32 %v1446_v6, %v167_v7 }
  0xfe   :  { %v1544_v9 = vpop.f32.mrf.mxu1 }
  0xff   :  { %v2022_v10 = vpack.c.bf16 %v168_v8, %v168_v8 }
 0x100   :  { %v170_v11 = vpop.f32.mrf.mxu1 }
 0x101   :  { %v171_v12 = vadd.f32 %v1446_v6, %v170_v11  ;;  %177 = vrot.lane.b32.xlu0 %v2022_v10, %s1884_s0 }
 0x102   :  { %v1545_v13 = vpop.f32.mrf.mxu1 }
 0x103   :  { %v2025_v14 = vpack.c.bf16 %v171_v12, %v171_v12 }
 0x105   :  { %227 = vrot.lane.b32.xlu0 %v2025_v14, %s1884_s0 }
 0x109   :  { %295 = vrot.lane.b32.xlu0 %v2022_v10, %s1878_s30 }
 0x10d   :  { %398 = vrot.lane.b32.xlu0 %v2022_v10, %s1885_s20 }
 0x111   :  { %448 = vrot.lane.b32.xlu0 %v2025_v14, %s1885_s20 }
 0x115   :  { %396 = vrot.lane.b32.xlu0 %v2022_v10, %s1886_s3 }
 0x119   :  { %446 = vrot.lane.b32.xlu0 %v2025_v14, %s1886_s3 }
 0x173   :  { %v178_v15 = vpop.permute.xlu0 %177 }
 0x174   :  { %v184_v16 = vsel %vm179_vm2, %v178_v15, 0 }
 0x175   :  { %1547 = vmatpush3.bf16.xpose.msra.mxu1 %v184_v16 }
 0x176   :  { %1558 = vmatprep.subr.bf16.mxu1 %v1882_v0 }
 0x177   :  { %v228_v17 = vpop.permute.xlu0 %227 }
 0x178   :  { %v233_v18 = vsel %vm179_vm2, %v228_v17, 0 }
 0x179   :  { %1553 = vmatpush3.bf16.xpose.msra.mxu0 %v233_v18 }
 0x17a   :  { %1564 = vmatprep.subr.bf16.mxu0 %v1882_v0 }
 0x17b   :  { %v296_v19 = vpop.permute.xlu0 %295 }
 0x17c   :  { %v302_v20 = vsel %vm300_vm3, %v296_v19, 0  ;;  %1549 = vmatmul.mubr.msk.bf16.vlgmr.msra.gmra.mxu1 %vm179_vm2, %v2022_v10 }
 0x17d   :  { %1559 = vmatpush3.bf16.msra.mxu1 %v302_v20  ;;  %1560 = vmatprep.mubr.msk.bf16.mxu1 %vm1883_vm0, %v1882_v0 }
 0x17e   :  { %1570 = vmatprep.subr.bf16.mxu1 %v1882_v0 }
 0x17f   :  { %v399_v44 = vpop.permute.xlu0 %398 }
 0x180   :  { %1555 = vmatmul.mubr.msk.bf16.vlgmr.msra.gmra.mxu0 %vm179_vm2, %v2025_v14  ;;  %v404_v48 = vsel %vm179_vm2, %v399_v44, 0 }
 0x181   :  { %1566 = vmatprep.mubr.msk.bf16.mxu0 %vm1883_vm0, %v1882_v0 }
 0x183   :  { %v449_v47 = vpop.permute.xlu0 %448 }
 0x184   :  { %v454_v51 = vsel %vm179_vm2, %v449_v47, 0 }
 0x187   :  { %v397_v52 = vpop.permute.xlu0 %396 }
 0x18b   :  { %v447_v53 = vpop.permute.xlu0 %446 }
 0x23c   :  { %v220_v23 = vpop.f32.mrf.mxu1 }
 0x23d   :  { %v221_v24 = vadd.f32 %v2048_v22, %v220_v23 }
 0x23e   :  { %v1550_v26 = vpop.f32.mrf.mxu1 }
 0x23f   :  { %v275_v27 = vsel %vm179_vm2, %v221_v24, -inf }
 0x240   :  { %v269_v28 = vpop.f32.mrf.mxu0  ;;  %276 = vmax.xlane.f32.xlu1 %v275_v27  ;;  %v223_v29 = vpop.f32.mrf.mxu1 }
 0x241   :  { %v270_v30 = vadd.f32 %v2051_v25, %v269_v28 }
 0x242   :  { %v1551_v31 = vpop.f32.mrf.mxu1  ;;  %v1556_v32 = vpop.f32.mrf.mxu0 }
 0x243   :  { %v278_v33 = vsel %vm179_vm2, %v270_v30, -inf }
 0x244   :  { %v272_v34 = vpop.f32.mrf.mxu0  ;;  %279 = vmax.xlane.f32.xlu1 %v278_v33 }
 0x246   :  { %v1557_v35 = vpop.f32.mrf.mxu0 }
 0x255   :  { %344 = vrot.lane.b32.xlu1 %v2025_v14, %s1878_s30  ;;  %s1887_s30 = smov 56  }
 0x2c9   :  { %v277_v36 = vpop.xlane.xlu1 %276 }
 0x2ca   :  { %v281_v37 = vsub.f32 %v221_v24, %v277_v36 }
 0x2cc   :  { %v283_v38 = vmul.f32 1.442695, %v281_v37 }
 0x2cd   :  { %v280_v39 = vpop.xlane.xlu1 %279 }
 0x2ce   :  { %1728 = vpow2.f32 %v283_v38  ;;  %v282_v40 = vsub.f32 %v270_v30, %v280_v39 }
 0x2d0   :  { %v285_v41 = vmul.f32 1.442695, %v282_v40 }
 0x2d1   :  { %v345_v42 = vpop.permute.xlu1 %344 }
 0x2d2   :  { %1730 = vpow2.f32 %v285_v41  ;;  %v350_v43 = vsel %vm300_vm3, %v345_v42, 0 }
 0x2d3   :  { %1565 = vmatpush3.bf16.msra.mxu0 %v350_v43 }
 0x2d4   :  { %1576 = vmatprep.subr.bf16.mxu0 %v1882_v0 }
 0x2db   :  { %v2060_v45 = vpop.eup %1728 }
 0x2dc   :  { %v293_v46 = vpack.c.bf16 %v2060_v45, %v2060_v45 }
 0x2de   :  { %1561 = vmatmul.mubr.msk.bf16.vlgmr.msra.gmra.mxu1 %vm179_vm2, %v293_v46 }
 0x2df   :  { %v2066_v49 = vpop.eup %1730  ;;  %1571 = vmatpush3.bf16.xpose.msra.mxu1 %v404_v48  ;;  %1572 = vmatprep.mubr.msk.bf16.mxu1 %vm1883_vm0, %v1882_v0 }
 0x2e0   :  { %v294_v50 = vpack.c.bf16 %v2066_v49, %v2066_v49  ;;  %1582 = vmatprep.subr.bf16.mxu1 %v1882_v0 }
 0x2e2   :  { %1567 = vmatmul.mubr.msk.bf16.vlgmr.msra.gmra.mxu0 %vm179_vm2, %v294_v50 }
 0x2e3   :  { %1577 = vmatpush3.bf16.xpose.msra.mxu0 %v454_v51  ;;  %1578 = vmatprep.mubr.msk.bf16.mxu0 %vm1883_vm0, %v1882_v0 }
 0x2e4   :  { %1588 = vmatprep.subr.bf16.mxu0 %v1882_v0 }
 0x2e6   :  { %1573 = vmatmul.mubr.msk.bf16.vlgmr.msra.gmra.mxu1 %vm179_vm2, %v397_v52 }
 0x2e7   :  { %1584 = vmatprep.mubr.msk.bf16.mxu1 %vm1883_vm0, %v1882_v0 }
 0x2ea   :  { %1579 = vmatmul.mubr.msk.bf16.vlgmr.msra.gmra.mxu0 %vm179_vm2, %v447_v53 }
 0x2eb   :  { %1590 = vmatprep.mubr.msk.bf16.mxu0 %vm1883_vm0, %v1882_v0 }
 0x39e   :  { %v2084_v54 = vpop.f32.mrf.mxu1 }
 0x3a0   :  { %v1562_v55 = vpop.f32.mrf.mxu1 }
 0x3a2   :  { %v341_v56 = vpop.f32.mrf.mxu1  ;;  %v2086_v57 = vpop.f32.mrf.mxu0 }
 0x3a4   :  { %v1563_v58 = vpop.f32.mrf.mxu1  ;;  %v1568_v59 = vpop.f32.mrf.mxu0 }
 0x3a6   :  { %v389_v60 = vpop.f32.mrf.mxu0  ;;  %v440_v61 = vpop.f32.mrf.mxu1 }
 0x3a7   :  { %v441_v62 = vadd.f32 %v2048_v22, %v440_v61 }
 0x3a8   :  { %v1569_v63 = vpop.f32.mrf.mxu0  ;;  %v1574_v1 = vpop.f32.mrf.mxu1 }
 0x3a9   :  { %v496_v2 = vsel %vm179_vm2, %v441_v62, -inf }
 0x3aa   :  { %v490_v6 = vpop.f32.mrf.mxu0  ;;  %497 = vmax.xlane.f32.xlu1 %v496_v2  ;;  %v443_v7 = vpop.f32.mrf.mxu1 }
 0x3ab   :  { %v491_v8 = vadd.f32 %v2051_v25, %v490_v6 }
 0x3ac   :  { %v1575_v9 = vpop.f32.mrf.mxu1  ;;  %v1580_v11 = vpop.f32.mrf.mxu0 }
 0x3ad   :  { %v499_v12 = vsel %vm179_vm2, %v491_v8, -inf }
 0x3ae   :  { %500 = vmax.xlane.f32.xlu0 %v499_v12  ;;  %v493_v13 = vpop.f32.mrf.mxu0 }
 0x3b0   :  { %v1581_v15 = vpop.f32.mrf.mxu0 }
 0x3bb   :  { %564 = vrot.lane.b32.xlu1 %v2025_v14, %s1887_s30 }
 0x3bf   :  { %618 = vrot.lane.b32.xlu1 %v2022_v10, %s1888_s21 }
 0x3c3   :  { %616 = vrot.lane.b32.xlu1 %v2022_v10, %s1889_s22 }
 0x3c4   :  { %516 = vrot.lane.b32.xlu0 %v2022_v10, %s1887_s30 }
 0x3c8   :  { %668 = vrot.lane.b32.xlu0 %v2025_v14, %s1888_s21  ;;  %s1897_s21 = smov [#allocation10]  }
 0x3cc   :  { %666 = vrot.lane.b32.xlu0 %v2025_v14, %s1889_s22  ;;  %s1432_s22 = sshll.u32 %s1897_s21, 4  ;;  %s1433_s22 = int_to_ptr.vmem [resolvable:$true] %s1432_s22 }
 0x3cd   :  { %p1853_p7 = scmp.lt.s32.totalorder %s1433_s22, %s1433_s22 }
 0x433   :  { %v498_v16 = vpop.xlane.xlu1 %497 }
 0x434   :  { %v502_v17 = vsub.f32 %v441_v62, %v498_v16 }
 0x436   :  { %v504_v18 = vmul.f32 1.442695, %v502_v17 }
 0x437   :  { %v501_v19 = vpop.xlane.xlu0 %500  ;;  %v565_v20 = vpop.permute.xlu1 %564 }
 0x438   :  { %1732 = vpow2.f32 %v504_v18  ;;  %v503_v21 = vsub.f32 %v491_v8, %v501_v19  ;;  %v570_v23 = vsel %vm300_vm3, %v565_v20, 0 }
 0x439   :  { %1589 = vmatpush3.bf16.msra.mxu0 %v570_v23 }
 0x43a   :  { %v506_v24 = vmul.f32 1.442695, %v503_v21  ;;  %1600 = vmatprep.subr.bf16.mxu0 %v1882_v0 }
 0x43b   :  { %v517_v26 = vpop.permute.xlu0 %516  ;;  %v619_v29 = vpop.permute.xlu1 %618 }
 0x43c   :  { %1734 = vpow2.f32 %v506_v24  ;;  %v522_v27 = vsel %vm300_vm3, %v517_v26, 0  ;;  %v624_v31 = vsel %vm179_vm2, %v619_v29, 0 }
 0x43d   :  { %1583 = vmatpush3.bf16.msra.mxu1 %v522_v27 }
 0x43e   :  { %1594 = vmatprep.subr.bf16.mxu1 %v1882_v0 }
 0x43f   :  { %v669_v33 = vpop.permute.xlu0 %668  ;;  %v617_v36 = vpop.permute.xlu1 %616 }
 0x440   :  { %v674_v35 = vsel %vm179_vm2, %v669_v33, 0 }
 0x443   :  { %v667_v37 = vpop.permute.xlu0 %666 }
 0x445   :  { %v2102_v28 = vpop.eup %1732 }
 0x446   :  { %v514_v30 = vpack.c.bf16 %v2102_v28, %v2102_v28 }
 0x448   :  { %1585 = vmatmul.mubr.msk.bf16.vlgmr.msra.gmra.mxu1 %vm179_vm2, %v514_v30 }
 0x449   :  { %v2108_v32 = vpop.eup %1734  ;;  %1595 = vmatpush3.bf16.xpose.msra.mxu1 %v624_v31  ;;  %1596 = vmatprep.mubr.msk.bf16.mxu1 %vm1883_vm0, %v1882_v0 }
 0x44a   :  { %v515_v34 = vpack.c.bf16 %v2108_v32, %v2108_v32  ;;  %1606 = vmatprep.subr.bf16.mxu1 %v1882_v0 }
 0x44c   :  { %1591 = vmatmul.mubr.msk.bf16.vlgmr.msra.gmra.mxu0 %vm179_vm2, %v515_v34 }
 0x44d   :  { %1601 = vmatpush3.bf16.xpose.msra.mxu0 %v674_v35  ;;  %1602 = vmatprep.mubr.msk.bf16.mxu0 %vm1883_vm0, %v1882_v0 }
 0x44e   :  { %1612 = vmatprep.subr.bf16.mxu0 %v1882_v0 }
 0x450   :  { %1597 = vmatmul.mubr.msk.bf16.vlgmr.msra.gmra.mxu1 %vm179_vm2, %v617_v36 }
 0x451   :  { %1608 = vmatprep.mubr.msk.bf16.mxu1 %vm1883_vm0, %v1882_v0 }
 0x454   :  { %1603 = vmatmul.mubr.msk.bf16.vlgmr.msra.gmra.mxu0 %vm179_vm2, %v667_v37 }
 0x455   :  { %1614 = vmatprep.mubr.msk.bf16.mxu0 %vm1883_vm0, %v1882_v0 }
 0x508   :  { %v2126_v38 = vpop.f32.mrf.mxu1 }
 0x50a   :  { %v1586_v39 = vpop.f32.mrf.mxu1 }
 0x50c   :  { %v561_v40 = vpop.f32.mrf.mxu1  ;;  %v2128_v41 = vpop.f32.mrf.mxu0 }
 0x50e   :  { %v1587_v42 = vpop.f32.mrf.mxu1  ;;  %v1592_v43 = vpop.f32.mrf.mxu0 }
 0x510   :  { %v609_v44 = vpop.f32.mrf.mxu0  ;;  %v660_v46 = vpop.f32.mrf.mxu1 }
 0x511   :  { %v661_v47 = vadd.f32 %v2048_v22, %v660_v46 }
 0x512   :  { %v1593_v48 = vpop.f32.mrf.mxu0  ;;  %v1598_v50 = vpop.f32.mrf.mxu1 }
 0x513   :  { %v716_v51 = vsel %vm179_vm2, %v661_v47, -inf }
 0x514   :  { %v710_v52 = vpop.f32.mrf.mxu0  ;;  %717 = vmax.xlane.f32.xlu1 %v716_v51  ;;  %v663_v53 = vpop.f32.mrf.mxu1 }
 0x515   :  { %v711_v55 = vadd.f32 %v2051_v25, %v710_v52  ;;  %v511_v52 = vsel %vm179_vm2, %v2108_v32, 0.0 }
 0x516   :  { %v1599_v56 = vpop.f32.mrf.mxu1  ;;  %v1604_v58 = vpop.f32.mrf.mxu0 }
 0x517   :  { %v719_v59 = vsel %vm179_vm2, %v711_v55, -inf }
 0x518   :  { %720 = vmax.xlane.f32.xlu0 %v719_v59  ;;  %v713_v60 = vpop.f32.mrf.mxu0 }
 0x51a   :  { %v1605_v61 = vpop.f32.mrf.mxu0 }
 0x525   :  { %784 = vrot.lane.b32.xlu1 %v2025_v14, %s1890_s23 }
 0x529   :  { %838 = vrot.lane.b32.xlu1 %v2022_v10, %s1891_s6 }
 0x52d   :  { %836 = vrot.lane.b32.xlu1 %v2022_v10, %s1892_s24 }
 0x52e   :  { %736 = vrot.lane.b32.xlu0 %v2022_v10, %s1890_s23  ;;  %s1848_s23 = scalar_lea.vmem %s1433_s22, 256 }
 0x52f   :  { %p1849_p6 = scmp.ne.s32.totalorder %s1433_s22, %s1848_s23  ;;  %p1854_p8 = scmp.lt.s32.totalorder %s1848_s23, %s1848_s23 }
 0x531   :  { %p1855_p9 = por %p1854_p8, %p1853_p7 }
 0x532   :  { %888 = vrot.lane.b32.xlu0 %v2025_v14, %s1891_s6 }
 0x533   :  { %p1856_p10 = pnand %p1855_p9, %p1849_p6 }
 0x536   :  { %886 = vrot.lane.b32.xlu0 %v2025_v14, %s1892_s24 }
 0x59d   :  { %v718_v62 = vpop.xlane.xlu1 %717 }
 0x59e   :  { %v722_v63 = vsub.f32 %v661_v47, %v718_v62 }
 0x5a0   :  { %v724_v1 = vmul.f32 1.442695, %v722_v63 }
 0x5a1   :  { %v721_v2 = vpop.xlane.xlu0 %720  ;;  %v785_v6 = vpop.permute.xlu1 %784 }
 0x5a2   :  { %1736 = vpow2.f32 %v724_v1  ;;  %v723_v7 = vsub.f32 %v711_v55, %v721_v2  ;;  %v790_v8 = vsel %vm300_vm3, %v785_v6, 0 }
 0x5a3   :  { %1613 = vmatpush3.bf16.msra.mxu0 %v790_v8 }
 0x5a4   :  { %v726_v9 = vmul.f32 1.442695, %v723_v7  ;;  %1624 = vmatprep.subr.bf16.mxu0 %v1882_v0  ;;  %v287_v7 = vsel %vm179_vm2, %v2060_v45, 0.0 }
 0x5a5   :  { %v737_v11 = vpop.permute.xlu0 %736  ;;  %v839_v15 = vpop.permute.xlu1 %838 }
 0x5a6   :  { %1738 = vpow2.f32 %v726_v9  ;;  %v742_v12 = vsel %vm300_vm3, %v737_v11, 0  ;;  %v844_v17 = vsel %vm179_vm2, %v839_v15, 0  ;;  %v290_v9 = vsel %vm179_vm2, %v2066_v49, 0.0 }
 0x5a7   :  { %1607 = vmatpush3.bf16.msra.mxu1 %v742_v12 }
 0x5a8   :  { %1618 = vmatprep.subr.bf16.mxu1 %v1882_v0 }
 0x5a9   :  { %v889_v19 = vpop.permute.xlu0 %888  ;;  %v837_v23 = vpop.permute.xlu1 %836 }
 0x5aa   :  { %v894_v21 = vsel %vm179_vm2, %v889_v19, 0 }
 0x5ad   :  { %v887_v24 = vpop.permute.xlu0 %886 }
 0x5af   :  { %v1737_v13 = vpop.eup %1736 }
 0x5b0   :  { %v734_v16 = vpack.c.bf16 %v1737_v13, %v1737_v13  ;;  %v728_v53 = vsel %vm179_vm2, %v1737_v13, 0.0 }
 0x5b2   :  { %1609 = vmatmul.mubr.msk.bf16.vlgmr.msra.gmra.mxu1 %vm179_vm2, %v734_v16 }
 0x5b3   :  { %v1739_v18 = vpop.eup %1738  ;;  %1619 = vmatpush3.bf16.xpose.msra.mxu1 %v844_v17  ;;  %1620 = vmatprep.mubr.msk.bf16.mxu1 %vm1883_vm0, %v1882_v0 }
 0x5b4   :  { %v735_v20 = vpack.c.bf16 %v1739_v18, %v1739_v18  ;;  %1630 = vmatprep.subr.bf16.mxu1 %v1882_v0 }
 0x5b6   :  { %1615 = vmatmul.mubr.msk.bf16.vlgmr.msra.gmra.mxu0 %vm179_vm2, %v735_v20 }
 0x5b7   :  { %1625 = vmatpush3.bf16.xpose.msra.mxu0 %v894_v21  ;;  %1626 = vmatprep.mubr.msk.bf16.mxu0 %vm1883_vm0, %v1882_v0 }
 0x5b8   :  { %1636 = vmatprep.subr.bf16.mxu0 %v1882_v0 }
 0x5ba   :  { %1621 = vmatmul.mubr.msk.bf16.vlgmr.msra.gmra.mxu1 %vm179_vm2, %v837_v23 }
 0x5bb   :  { %1632 = vmatprep.mubr.msk.bf16.mxu1 %vm1883_vm0, %v1882_v0 }
 0x5be   :  { %1627 = vmatmul.mubr.msk.bf16.vlgmr.msra.gmra.mxu0 %vm179_vm2, %v887_v24 }
 0x5bf   :  { %1638 = vmatprep.mubr.msk.bf16.mxu0 %vm1883_vm0, %v1882_v0 }
 0x672   :  { %v2160_v26 = vpop.f32.mrf.mxu1 }
 0x674   :  { %v1610_v27 = vpop.f32.mrf.mxu1 }
 0x675   :  { %v1718_v27 = vld [vmem:[%s2264_s4 + $0x8] sm:$0xff]  }
 0x676   :  { %v781_v29 = vpop.f32.mrf.mxu1  ;;  %v2162_v30 = vpop.f32.mrf.mxu0 }
 0x678   :  { %v1611_v31 = vpop.f32.mrf.mxu1  ;;  %v1616_v33 = vpop.f32.mrf.mxu0 }
 0x67a   :  { %v829_v34 = vpop.f32.mrf.mxu0  ;;  %v880_v35 = vpop.f32.mrf.mxu1 }
 0x67b   :  { %v881_v36 = vadd.f32 %v2048_v22, %v880_v35  ;;  %v508_v22 = vsel %vm179_vm2, %v2102_v28, 0.0 }
 0x67c   :  { %v1617_v37 = vpop.f32.mrf.mxu0  ;;  %v1622_v39 = vpop.f32.mrf.mxu1 }
 0x67d   :  { %v936_v40 = vsel %vm179_vm2, %v881_v36, -inf }
 0x67e   :  { %v930_v42 = vpop.f32.mrf.mxu0  ;;  %937 = vmax.xlane.f32.xlu1 %v936_v40  ;;  %v883_v43 = vpop.f32.mrf.mxu1 }
 0x67f   :  { %v931_v44 = vadd.f32 %v2051_v25, %v930_v42  ;;  %v731_v25 = vsel %vm179_vm2, %v1739_v18, 0.0 }
 0x680   :  { %v1623_v46 = vpop.f32.mrf.mxu1  ;;  %v1628_v47 = vpop.f32.mrf.mxu0 }
 0x681   :  { %v939_v48 = vsel %vm179_vm2, %v931_v44, -inf }
 0x682   :  { %940 = vmax.xlane.f32.xlu0 %v939_v48  ;;  %v933_v50 = vpop.f32.mrf.mxu0 }
 0x684   :  { %v1629_v51 = vpop.f32.mrf.mxu0 }
 0x68f   :  { %1004 = vrot.lane.b32.xlu1 %v2025_v14, %s1893_s25 }
 0x698   :  { %956 = vrot.lane.b32.xlu0 %v2022_v10, %s1893_s25 }
 0x6b3   :  { %509 = vadd.xlane.f32.xlu1 %v508_v22 }
 0x6b7   :  { %512 = vadd.xlane.f32.xlu0 %v511_v52  ;;  %732 = vadd.xlane.f32.xlu1 %v731_v25 }
 0x6bb   :  { %729 = vadd.xlane.f32.xlu0 %v728_v53 }
 0x707   :  { %v938_v55 = vpop.xlane.xlu1 %937 }
 0x708   :  { %v942_v56 = vsub.f32 %v881_v36, %v938_v55 }
 0x70a   :  { %v944_v58 = vmul.f32 1.442695, %v942_v56 }
 0x70b   :  { %v941_v14 = vpop.xlane.xlu0 %940  ;;  %v1005_v59 = vpop.permute.xlu1 %1004 }
 0x70c   :  { %1740 = vpow2.f32 %v944_v58  ;;  %v943_v10 = vsub.f32 %v931_v44, %v941_v14  ;;  %v1010_v28 = vsel %vm300_vm3, %v1005_v59, 0 }
 0x70d   :  { %1637 = vmatpush3.bf16.msra.mxu0 %v1010_v28 }
 0x70e   :  { %v946_v60 = vmul.f32 1.442695, %v943_v10  ;;  %1650 = vmatprep.subr.bf16.mxu0 %v1882_v0 }
 0x70f   :  { %v957_v32 = vpop.permute.xlu0 %956 }
 0x710   :  { %1742 = vpow2.f32 %v946_v60  ;;  %v962_v61 = vsel %vm300_vm3, %v957_v32, 0 }
 0x711   :  { %1631 = vmatpush3.bf16.msra.mxu1 %v962_v61 }
 0x712   :  { %1642 = vmatprep.subr.bf16.mxu1 %v1882_v0 }
 0x719   :  { %v1741_v62 = vpop.eup %1740 }
 0x71a   :  { %v948_v63 = vsel %vm179_vm2, %v1741_v62, 0.0  ;;  %v954_v1 = vpack.c.bf16 %v1741_v62, %v1741_v62 }
 0x71b   :  { %949 = vadd.xlane.f32.xlu0 %v948_v63 }
 0x71c   :  { %1633 = vmatmul.mubr.msk.bf16.vlgmr.msra.gmra.mxu1 %vm179_vm2, %v954_v1  ;;  %v1720_v1 = vld [vmem:[#allocation5 + $0x8] sm:$0xff]  }
 0x71d   :  { %v1743_v2 = vpop.eup %1742  ;;  %1646 = vmatprep.mubr.msk.bf16.mxu1 %vm1883_vm0, %v1882_v0  ;;  %1643 = vmatpush3.bf16.msra.mxu1 %v1718_v27 }
 0x71e   :  { %v951_v6 = vsel %vm179_vm2, %v1743_v2, 0.0  ;;  %v955_v8 = vpack.c.bf16 %v1743_v2, %v1743_v2  ;;  %1644 = vmatprep.subr.bf16.mxu1 %v1882_v0 }
 0x71f   :  { %952 = vadd.xlane.f32.xlu1 %v951_v6  ;;  %288 = vadd.xlane.f32.xlu0 %v287_v7  ;;  %v1723_v6 = vld [vmem:[#allocation7] sm:$0xff]  }
 0x720   :  { %1639 = vmatmul.mubr.msk.bf16.vlgmr.msra.gmra.mxu0 %vm179_vm2, %v955_v8  ;;  %v1466_v8 = vld [vmem:[%s2265_s5] ss:$0 sm:$0xff] }
 0x721   :  { %1654 = vmatprep.mubr.msk.bf16.mxu0 %vm1883_vm0, %v1882_v0 }
 0x723   :  { %291 = vadd.xlane.f32.xlu1 %v290_v9 }
 0x73c   :  { %v510_v11 = vpop.xlane.xlu1 %509 }
 0x73d   :  { %1744 = vrcp.f32 %v510_v11 }
 0x740   :  { %v513_v12 = vpop.xlane.xlu0 %512  ;;  %v733_v13 = vpop.xlane.xlu1 %732 }
 0x741   :  { %1746 = vrcp.f32 %v513_v12 }
 0x742   :  { %1748 = vrcp.f32 %v733_v13 }
 0x744   :  { %v730_v15 = vpop.xlane.xlu0 %729 }
 0x745   :  { %1750 = vrcp.f32 %v730_v15 }
 0x74a   :  { %v1745_v45 = vpop.eup %1744 }
 0x74b   :  { %v614_v17 = vmul.f32 %v1745_v45, %v2126_v38 }
 0x74e   :  { %v1747_v16 = vpop.eup %1746 }
 0x74f   :  { %v615_v18 = vmul.f32 %v1747_v16, %v2128_v41  ;;  %v1749_v19 = vpop.eup %1748 }
 0x750   :  { %v835_v23 = vmul.f32 %v1749_v19, %v2162_v30 }
 0x751   :  { %v1701_v20 = vpack.i.bf16 %v615_v18, %v614_v17 }
 0x752   :  { %v1751_v21 = vpop.eup %1750 }
 0x753   :  { %1702 = vrot.lane.b32.xlu0 %v1701_v20, %s1894_s1  ;;  %v834_v49 = vmul.f32 %v1751_v21, %v2160_v26  ;;  %v1719_v26 = vld [vmem:[%s2264_s4] sm:$0xff]  }
 0x754   :  { %1645 = vmatpush3.bf16.msra.mxu1 %v1719_v26  ;;  %v1476_v20 = vld [vmem:[%s2268_s8] ss:$0 sm:$0xff] }
 0x755   :  { %v1706_v24 = vpack.i.bf16 %v835_v23, %v834_v49  ;;  %1658 = vmatprep.subr.bf16.mxu1 %v1882_v0 }
 0x757   :  { %1707 = vrot.lane.b32.xlu1 %v1706_v24, %s1895_s26 }
 0x7a4   :  { %v950_v38 = vpop.xlane.xlu0 %949 }
 0x7a5   :  { %1752 = vrcp.f32 %v950_v38 }
 0x7a8   :  { %v953_v41 = vpop.xlane.xlu1 %952  ;;  %v289_v46 = vpop.xlane.xlu0 %288 }
 0x7a9   :  { %1754 = vrcp.f32 %v953_v41 }
 0x7aa   :  { %1756 = vrcp.f32 %v289_v46  ;;  %v1726_v46 = vld [vmem:[%s2271_s11 + $0x8] sm:$0xff]  }
 0x7ac   :  { %v292_v47 = vpop.xlane.xlu1 %291 }
 0x7ad   :  { %1758 = vrcp.f32 %v292_v47  ;;  %v1727_v47 = vld [vmem:[%s2271_s11] sm:$0xff]  }
 0x7b2   :  { %v1753_v31 = vpop.eup %1752 }
 0x7b6   :  { %v1755_v33 = vpop.eup %1754 }
 0x7b7   :  { %v1757_v50 = vpop.eup %1756 }
 0x7b8   :  { %v394_v56 = vmul.f32 %v1757_v50, %v2084_v54  ;;  %v1721_v54 = vld [vmem:[#allocation5] sm:$0xff]  }
 0x7ba   :  { %v1759_v22 = vpop.eup %1758 }
 0x7bb   :  { %v395_v58 = vmul.f32 %v1759_v22, %v2086_v57  ;;  %v1722_v57 = vld [vmem:[#allocation7 + $0x8] sm:$0xff]  }
 0x7bc   :  { %1651 = vmatpush3.bf16.msra.mxu0 %v1722_v57 }
 0x7bd   :  { %1652 = vmatprep.subr.bf16.mxu0 %v1882_v0 }
 0x7c0   :  { %1653 = vmatpush3.bf16.msra.mxu0 %v1723_v6 }
 0x7c1   :  { %1666 = vmatprep.subr.bf16.mxu0 %v1882_v0 }
 0x7c5   :  { %v1703_v48 = vpop.permute.xlu0 %1702 }
 0x7c6   :  { %v1705_v52 = vunpack.i.h.bf16 %v1703_v48  ;;  %v1704_v25 = vunpack.i.l.bf16 %v1703_v48 }
 0x7c8   :  { %v1080_v59 = vsel %vm179_vm2, %v394_v56, %v1704_v25  ;;  %v1081_v10 = vsel %vm179_vm2, %v395_v58, %v1705_v52  ;;  %v1478_v58 = vld [vmem:[#allocation8] ss:$0 sm:$0xff] }
 0x7c9   :  { %v1708_v51 = vpop.permute.xlu1 %1707 }
 0x7ca   :  { %v1710_v53 = vunpack.i.h.bf16 %v1708_v51  ;;  %v1709_v55 = vunpack.i.l.bf16 %v1708_v51 }
 0x7cc   :  { %v1084_v32 = vsel %vm1082_vm4, %v1081_v10, %v1710_v53  ;;  %v1083_v61 = vsel %vm1082_vm4, %v1080_v59, %v1709_v55  ;;  %v1477_v55 = vld [vmem:[%s2269_s9] ss:$0 sm:$0xff] }
 0x7dc   :  { %v998_v29 = vpop.f32.mrf.mxu1 }
 0x7dd   :  { %v1054_v36 = vmul.f32 %v1753_v31, %v998_v29 }
 0x7de   :  { %v1634_v30 = vpop.f32.mrf.mxu1 }
 0x7e0   :  { %v1001_v34 = vpop.f32.mrf.mxu1  ;;  %v1046_v35 = vpop.f32.mrf.mxu0 }
 0x7e1   :  { %v1055_v37 = vmul.f32 %v1755_v33, %v1046_v35 }
 0x7e2   :  { %v1635_v39 = vpop.f32.mrf.mxu1  ;;  %v1640_v40 = vpop.f32.mrf.mxu0 }
 0x7e3   :  { %v1711_v42 = vpack.i.bf16 %v1055_v37, %v1054_v36 }
 0x7e4   :  { %v1049_v43 = vpop.f32.mrf.mxu0 }
 0x7e5   :  { %1712 = vrot.lane.b32.xlu1 %v1711_v42, %s1896_s29  ;;  %v1724_v43 = vld [vmem:[%s2271_s11 + $0x18] sm:$0xff]  }
 0x7e6   :  { %v1641_v44 = vpop.f32.mrf.mxu0 }
 0x7e7   :  { %v1725_v44 = vld [vmem:[%s2271_s11 + $0x10] sm:$0xff]  }
 0x857   :  { %v1713_v14 = vpop.permute.xlu1 %1712 }
 0x858   :  { %v1715_v28 = vunpack.i.h.bf16 %v1713_v14  ;;  %v1714_v60 = vunpack.i.l.bf16 %v1713_v14 }
 0x85a   :  { %v1087_v62 = vsel %vm1085_vm5, %v1084_v32, %v1715_v28  ;;  %v1086_v63 = vsel %vm1085_vm5, %v1083_v61, %v1714_v60 }
 0x85b   :  { %v1088_v2 = vpack.c.bf16 %v1087_v62, %v1086_v63 }
 0x85d   :  { %1647 = vmatmul.mubr.msk.bf16.vlgmr.msra.gmra.mxu1 %vm129_vm1, %v1088_v2 }
 0x85e   :  { %1659 = vmatpush3.bf16.msra.mxu1 %v1720_v1  ;;  %1662 = vmatprep.mubr.msk.bf16.mxu1 %vm1883_vm0, %v1882_v0 }
 0x85f   :  { %1660 = vmatprep.subr.bf16.mxu1 %v1882_v0 }
 0x862   :  { %1661 = vmatpush3.bf16.msra.mxu1 %v1721_v54 }
 0x865   :  { %1663 = vmatmul.mubr.msk.bf16.vlgmr.msra.gmra.mxu1 %vm129_vm1, %v2012_v5 }
 0x91d   :  { %v1149_v7 = vpop.f32.mrf.mxu1 }
 0x91e   :  { %v1150_v12 = vadd.f32 %v1466_v8, %v1149_v7 }
 0x91f   :  { %v1648_v9 = vpop.f32.mrf.mxu1 }
 0x920   :  { %v1479_v9 = vld [vmem:[%s2272_s12] ss:$0 sm:$0xff] }
 0x921   :  { %v1152_v11 = vpop.f32.mrf.mxu1 }
 0x922   :  { %v1153_v13 = vadd.f32 %v1466_v8, %v1152_v11 }
 0x923   :  { %v1649_v15 = vpop.f32.mrf.mxu1 }
 0x924   :  { %v1156_v45 = vpack.c.bf16 %v1153_v13, %v1150_v12 }
 0x925   :  { %v1267_v5 = vpop.f32.mrf.mxu1 }
 0x926   :  { %1655 = vmatmul.mubr.msk.bf16.vlgmr.msra.gmra.mxu0 %vm129_vm1, %v1156_v45 }
 0x927   :  { %1674 = vmatprep.mubr.msk.bf16.mxu0 %vm1883_vm0, %v1882_v0  ;;  %v1664_v16 = vpop.f32.mrf.mxu1  ;;  %1667 = vmatpush3.bf16.msra.mxu0 %v1724_v43 }
 0x928   :  { %1668 = vmatprep.subr.bf16.mxu0 %v1882_v0 }
 0x929   :  { %v1270_v17 = vpop.f32.mrf.mxu1 }
 0x92b   :  { %v1665_v18 = vpop.f32.mrf.mxu1  ;;  %1669 = vmatpush3.bf16.msra.mxu0 %v1725_v44 }
 0x92c   :  { %1670 = vmatprep.subr.bf16.mxu0 %v1882_v0 }
 0x92f   :  { %1671 = vmatpush3.bf16.msra.mxu0 %v1726_v46 }
 0x930   :  { %1672 = vmatprep.subr.bf16.mxu0 %v1882_v0 }
 0x933   :  { %1673 = vmatpush3.bf16.msra.mxu0 %v1727_v47 }
 0x9e6   :  { %v1214_v19 = vpop.f32.mrf.mxu0 }
 0x9e7   :  { %v1268_v21 = vadd.f32 %v1267_v5, %v1214_v19 }
 0x9e8   :  { %v1656_v49 = vpop.f32.mrf.mxu0 }
 0x9e9   :  { %v1281_v23 = vadd.f32 %v1476_v20, %v1268_v21 }
 0x9ea   :  { %v1217_v24 = vpop.f32.mrf.mxu0 }
 0x9eb   :  { %v1271_v27 = vadd.f32 %v1270_v17, %v1217_v24  ;;  %v1284_v38 = vsel %vm1283_vm6, %v1281_v23, 0.0 }
 0x9ec   :  { %v1657_v41 = vpop.f32.mrf.mxu0  ;;  %1285 = vadd.xlane.f32.xlu0 %v1284_v38 }
 0x9ed   :  { %v1282_v26 = vadd.f32 %v1476_v20, %v1271_v27 }
 0x9ef   :  { %v1287_v29 = vsel %vm1283_vm6, %v1282_v26, 0.0 }
 0x9f0   :  { %1288 = vadd.xlane.f32.xlu1 %v1287_v29 }
 0xa75   :  { %v1286_v30 = vpop.xlane.xlu0 %1285 }
 0xa76   :  { %v1291_v31 = vmul.f32 0.015625, %v1286_v30 }
 0xa78   :  { %v1293_v33 = vsub.f32 %v1281_v23, %v1291_v31 }
 0xa79   :  { %v1289_v34 = vpop.xlane.xlu1 %1288 }
 0xa7a   :  { %v1292_v35 = vmul.f32 0.015625, %v1289_v34  ;;  %v1295_v36 = vmul.f32 %v1293_v33, %v1293_v33 }
 0xa7c   :  { %v1294_v37 = vsub.f32 %v1282_v26, %v1292_v35  ;;  %v1297_v39 = vsel %vm1283_vm6, %v1295_v36, 0.0 }
 0xa7d   :  { %1298 = vadd.xlane.f32.xlu0 %v1297_v39 }
 0xa7e   :  { %v1296_v40 = vmul.f32 %v1294_v37, %v1294_v37 }
 0xa80   :  { %v1300_v42 = vsel %vm1283_vm6, %v1296_v40, 0.0 }
 0xa81   :  { %1301 = vadd.xlane.f32.xlu0 %v1300_v42 }
 0xb06   :  { %v1299_v48 = vpop.xlane.xlu0 %1298 }
 0xb07   :  { %v1303_v50 = vmul.f32 0.015625, %v1299_v48 }
 0xb09   :  { %v1305_v51 = vadd.f32 1e-05, %v1303_v50 }
 0xb0a   :  { %v1302_v22 = vpop.xlane.xlu0 %1301 }
 0xb0b   :  { %1760 = vrsqrt.f32 %v1305_v51  ;;  %v1304_v52 = vmul.f32 0.015625, %v1302_v22 }
 0xb0d   :  { %v1306_v25 = vadd.f32 1e-05, %v1304_v52 }
 0xb0f   :  { %1762 = vrsqrt.f32 %v1306_v25 }
 0xb18   :  { %v1761_v53 = vpop.eup %1760 }
 0xb19   :  { %v1309_v56 = vmul.f32 %v1761_v53, %v1293_v33 }
 0xb1b   :  { %v1318_v14 = vmul.f32 %v1477_v55, %v1309_v56 }
 0xb1c   :  { %v1763_v59 = vpop.eup %1762 }
 0xb1d   :  { %v1310_v10 = vmul.f32 %v1763_v59, %v1294_v37  ;;  %v1327_v0 = vadd.f32 %v1478_v58, %v1318_v14 }
 0xb1f   :  { %v1319_v28 = vmul.f32 %v1477_v55, %v1310_v10  ;;  %v1331_v60 = vmul.f32 0.70710677, %v1327_v0  ;;  %v1329_v2 = vmul.f32 0.5, %v1327_v0 }
 0xb21   :  { %v1328_v32 = vadd.f32 %v1478_v58, %v1319_v28  ;;  %1764 = verf.f32 %v1331_v60 }
 0xb23   :  { %v1332_v61 = vmul.f32 0.70710677, %v1328_v32  ;;  %v1330_v54 = vmul.f32 0.5, %v1328_v32 }
 0xb25   :  { %1766 = verf.f32 %v1332_v61 }
 0xb2e   :  { %v1765_v62 = vpop.eup %1764 }
 0xb2f   :  { %v1335_v63 = vadd.f32 1.0, %v1765_v62 }
 0xb31   :  { %v1337_v6 = vmul.f32 %v1335_v63, %v1329_v2 }
 0xb32   :  { %v1767_v1 = vpop.eup %1766 }
 0xb33   :  { %v1336_v57 = vadd.f32 1.0, %v1767_v1 }
 0xb35   :  { %v1338_v7 = vmul.f32 %v1336_v57, %v1330_v54 }
 0xb37   :  { %v1339_v8 = vpack.c.bf16 %v1338_v7, %v1337_v6 }
 0xb39   :  { %1675 = vmatmul.mubr.msk.bf16.vlgmr.msra.gmra.mxu0 %vm1283_vm6, %v1339_v8 }
 0xbf9   :  { %v1416_v11 = vpop.f32.mrf.mxu0 }
 0xbfa   :  { %v1417_v12 = vadd.f32 %v1479_v9, %v1416_v11 }
 0xbfb   :  { %v1676_v13 = vpop.f32.mrf.mxu0 }
 0xbfc   :  { %v1423_v15 = vadd.f32 %v1417_v12, %v2002_v3 }
 0xbfd   :  { %v1419_v45 = vpop.f32.mrf.mxu0 }
 0xbfe   :  { %1425 = vst.msk [vmem:[#allocation10] sm:$0xff] %vm129_vm1, %v1423_v15  ;;  %v1420_v5 = vadd.f32 %v1479_v9, %v1419_v45 }
 0xbff   :  { %v1677_v16 = vpop.f32.mrf.mxu0 }
 0xc00   :  { %v1424_v17 = vadd.f32 %v1420_v5, %v2007_v4 }
 0xc02   :  { %1426 = vst.msk [vmem:[#allocation10 + $0x8] sm:$0xff] %vm129_vm1, %v1424_v17 }
 0xc03   :  { %1859 = shalt.err (!%p1856_p10)
}
 0xc04   :  { %s1898_s12 = smov 128  }
 0xc05   :  { %1438 = dma.vmem_to_hbm [thread:$0]  %s1433_s22, 256, %s2273_s13, [#allocation4], %s1898_s12, %s1898_s12, %s1894_s1  }
 0xc06   :  { %1874 = dma.done.wait [#allocation4], 256  }
 0xc07   :  { %1875 = vsyncadd [#allocation4], 4294967040 }
 0xc08   :  { %1442 = vsyncpa [#allocation3], 1 }
 0xc09   :  { %1443 = vsyncpa [#allocation6], 1 }
 0xc0a   :  { %1444 = vsyncpa [#allocation9], 1 }
 0xc0b   :  { %1445 = vsyncpa [#allocation4], 1 }

</bundles_post_ra>
